<compile_context>
chip_gen: v5e
topology: v5e:2x2
jax: 0.10.0
libtpu: 0.0.40
codegen_flags: <defaults>
</compile_context>

<pallas_src>
import jax
import jax.numpy as jnp
from jax.experimental import pallas as pl
from jax.experimental.pallas import tpu as pltpu


def _round_up(x, m):
    return ((x + m - 1) // m) * m


def _vmem_block_bytes(shape, itemsize=4):
    """Layout-aware VMEM footprint of one buffer: minor dim pads to 128 lanes,
    second-minor to 8 sublanes."""
    if len(shape) == 1:
        lead, s, m = 1, 1, shape[0]
    else:
        *lead_dims, s, m = shape
        lead = 1
        for d in lead_dims:
            lead *= d
    return lead * _round_up(s, 8) * _round_up(m, 128) * itemsize


def image_gcn_kernel(z1_ref, h1_ref, att_ref, adj_ref, ew_ref, rel_t_ref,
                     wa1_ref, wa2_ref, wa3_ref, br2_ref, ba_ref, out_ref,
                     msg1_acc, wrel_acc, degw_acc):
    f32 = jnp.float32
    src = pl.program_id(1)

    @pl.when(src == 0)
    def _():
        msg1_acc[...] = jnp.zeros_like(msg1_acc)
        wrel_acc[...] = jnp.zeros_like(wrel_acc)
        degw_acc[...] = jnp.zeros_like(degw_acc)

    # ---- node message partial reduce: msg1[i] += sum_{j in chunk} adj[i,j]*z1[j]
    msg1_acc[...] += jnp.dot(adj_ref[...], z1_ref[...],
                             preferred_element_type=f32)          # (TM, inP)

    # ---- edge message partial reduce (rel_fc folded into apply_fc) -------
    # ew is lane-dense (TM, SC); rel_t is (TM, relD, SC) so the multiply is
    # full-lane VPU work and the reduction is an XLU lane reduce.
    ew = ew_ref[...]                                              # (TM, SC)
    wrel_acc[...] += jnp.sum(ew[:, None, :] * rel_t_ref[...], axis=-1)   # (TM, relD)
    degw_acc[...] += jnp.sum(ew, axis=-1, keepdims=True)                 # (TM, 1)

    # ---- apply/relu tail on the last source chunk -------------------------
    @pl.when(src == pl.num_programs(1) - 1)
    def _():
        pre = (jnp.dot(msg1_acc[...], wa1_ref[...], preferred_element_type=f32)
               + jnp.dot(wrel_acc[...], wa2_ref[...], preferred_element_type=f32)
               + jnp.dot(h1_ref[...], wa3_ref[...], preferred_element_type=f32)
               + degw_acc[...] * br2_ref[...]
               + ba_ref[...])
        out_ref[...] = att_ref[...] * jnp.maximum(pre, 0.0)


def image_gcn_forward(h, att, adj, rel, rel_att, params, *,
                      edge_vmem_budget_bytes=None, use_bf16_msg1=False):
    """Dense-graph ImageGCN forward (one ImageGCNLayer) via a Pallas TPU kernel."""
    N, in_dim = h.shape
    rel_dim = rel.shape[-1]
    out_dim = params["w_apply"].shape[1]
    f32 = jnp.float32
    LANE = 128

    in_pd = _round_up(in_dim, LANE)    # lane-dense node features (MXU K/N = 128)
    out_pd = _round_up(out_dim, LANE)  # lane-dense (unmasked) output stores

    # ---- generation-aware VMEM budgeting ---------------------------------
    try:
        vmem_cap = int(getattr(pltpu.get_tpu_info(), "vmem_capacity_bytes",
                               64 * 1024 * 1024))
    except Exception:  # pragma: no cover - defensive (e.g. interpret mode)
        vmem_cap = 64 * 1024 * 1024
    if edge_vmem_budget_bytes is None:
        # ~half of physical VMEM for the streamed (double-buffered) edge blocks.
        edge_vmem_budget_bytes = min(96 * 1024 * 1024, vmem_cap // 2)

    stream_bytes = 2 if use_bf16_msg1 else 4   # adj / z1 itemsize

    def streamed_bytes(tm, sc):
        """Double-buffered VMEM for the per-(dst-tile, src-chunk) DMA'd blocks."""
        b = _vmem_block_bytes((tm, sc), stream_bytes)   # adj chunk
        b += _vmem_block_bytes((tm, sc), 4)             # edge_w chunk
        b += _vmem_block_bytes((tm, rel_dim, sc), 4)    # rel (transposed) chunk
        b += _vmem_block_bytes((sc, in_pd), stream_bytes)   # z1 chunk
        return 2 * b

    # ---- tile sizes --------------------------------------------------------
    n8 = _round_up(N, 8)
    if n8 <= LANE:
        tm, sc, n_pad = n8, n8, n8
    else:
        n128 = _round_up(N, LANE)
        tm = LANE
        if streamed_bytes(tm, n128) <= edge_vmem_budget_bytes:
            sc, n_pad = n128, n128
        else:
            sc = LANE
            while sc * 2 < n128 and streamed_bytes(tm, sc * 2) <= edge_vmem_budget_bytes:
                sc *= 2
            while tm > 8 and streamed_bytes(tm, sc) > edge_vmem_budget_bytes:
                tm //= 2
            n_pad = _round_up(N, sc)
    grid = (n_pad // tm, n_pad // sc)

    # ---- host-side prep (hoisted node_fc, folded rel_fc, padding) ---------
    def pad_to(x, shape, dtype=f32):
        x = jnp.asarray(x, f32)
        x = jnp.pad(x, [(0, t - s) for s, t in zip(x.shape, shape)])
        return x.astype(dtype)

    # apply_nodes is grid-invariant full-N work: do it once with plain XLA.
    h1_all = h.astype(f32) @ params["w_node"].astype(f32) + params["b_node"].astype(f32)
    z1_all = att.astype(f32) * h1_all

    z_dtype = jnp.bfloat16 if use_bf16_msg1 else f32
    z1_p = pad_to(z1_all, (n_pad, in_pd), z_dtype)
    h1_p = pad_to(h1_all, (n_pad, in_pd))
    att_p = pad_to(att, (n_pad, 1))
    adj_p = pad_to(adj, (n_pad, n_pad), z_dtype)           # 0/1 -> exact in bf16
    # Fold adjacency mask and per-edge attention into one lane-dense operand.
    edge_w = pad_to(adj * rel_att[:, :, 0], (n_pad, n_pad))
    # Transpose rel so the source axis lives on lanes inside the kernel.
    rel_t = pad_to(jnp.transpose(rel, (0, 2, 1)), (n_pad, rel_dim, n_pad))

    # apply_fc split on the host; rel_fc folded into its middle slice (linearity).
    wa = params["w_apply"].astype(f32)
    wa1 = pad_to(wa[:in_dim, :], (in_pd, out_pd))
    wa2_raw = wa[in_dim:in_dim + rel_dim, :]
    wa2 = pad_to(params["w_rel"].astype(f32) @ wa2_raw, (rel_dim, out_pd))
    br2 = pad_to(params["b_rel"].astype(f32) @ wa2_raw, (1, out_pd))
    wa3 = pad_to(wa[in_dim + rel_dim:, :], (in_pd, out_pd))
    ba = pad_to(params["b_apply"], (1, out_pd))

    # ---- BlockSpecs --------------------------------------------------------
    def invariant(*shape):
        zeros = (0,) * len(shape)
        return pl.BlockSpec(shape, lambda i, j, _z=zeros: _z)

    in_specs = [
        pl.BlockSpec((sc, in_pd), lambda i, j: (j, 0)),           # z1 (src chunk)
        pl.BlockSpec((tm, in_pd), lambda i, j: (i, 0)),           # h1 (dst tile)
        pl.BlockSpec((tm, 1), lambda i, j: (i, 0)),               # att (dst tile)
        pl.BlockSpec((tm, sc), lambda i, j: (i, j)),              # adj chunk
        pl.BlockSpec((tm, sc), lambda i, j: (i, j)),              # edge_w chunk
        pl.BlockSpec((tm, rel_dim, sc), lambda i, j: (i, 0, j)),  # rel_t chunk
        invariant(in_pd, out_pd),                                 # wa1
        invariant(rel_dim, out_pd),                               # wa2' (rel_fc folded)
        invariant(in_pd, out_pd),                                 # wa3
        invariant(1, out_pd),                                     # br2'
        invariant(1, out_pd),                                     # ba
    ]
    out_spec = pl.BlockSpec((tm, out_pd), lambda i, j: (i, 0))

    scratch_shapes = [
        pltpu.VMEM((tm, in_pd), f32),    # msg1 accumulator
        pltpu.VMEM((tm, rel_dim), f32),  # weighted-rel accumulator
        pltpu.VMEM((tm, 1), f32),        # weighted-degree accumulator
    ]

    # ---- layout-aware VMEM limit -------------------------------------------
    est = streamed_bytes(tm, sc)
    est += 2 * (_vmem_block_bytes((tm, in_pd)) + _vmem_block_bytes((tm, 1))
                + _vmem_block_bytes((tm, out_pd)))                        # dst-tile blocks
    est += 2 * (2 * _vmem_block_bytes((in_pd, out_pd))
                + _vmem_block_bytes((rel_dim, out_pd))
                + 2 * _vmem_block_bytes((1, out_pd)))                     # resident weights
    est += (_vmem_block_bytes((tm, in_pd)) + _vmem_block_bytes((tm, rel_dim))
            + _vmem_block_bytes((tm, 1)))                                 # scratch accs
    est += _vmem_block_bytes((tm, rel_dim, sc))                           # ew*rel temporary
    vmem_limit = max(int(1.25 * est), 16 * 1024 * 1024)
    vmem_limit = int(min(vmem_limit, int(0.9 * vmem_cap)))

    # TODO(synk): grid-invariant operands (z1, weights) could use
    # pipeline_mode=pl.Buffered(1) to halve their VMEM on v7x; left at the
    # default here for maximum compiler compatibility.
    out_padded = pl.pallas_call(
        image_gcn_kernel,
        out_shape=jax.ShapeDtypeStruct((n_pad, out_pd), f32),
        grid=grid,
        in_specs=in_specs,
        out_specs=out_spec,
        scratch_shapes=scratch_shapes,
        compiler_params=pltpu.CompilerParams(
            dimension_semantics=("parallel", "arbitrary"),
            vmem_limit_bytes=vmem_limit,
        ),
    )(z1_p, h1_p, att_p, adj_p, edge_w, rel_t, wa1, wa2, wa3, br2, ba)
    return out_padded[:N, :out_dim]


def init_params(key, in_dim, out_dim, rel_dim):
    """Deterministic nn.Linear-style init (uniform +-1/sqrt(fan_in))."""
    ks = jax.random.split(key, 6)

    def lin(kw, kb, fan_in, fan_out):
        bound = 1.0 / float(fan_in) ** 0.5
        w = jax.random.uniform(kw, (fan_in, fan_out), jnp.float32, -bound, bound)
        b = jax.random.uniform(kb, (1, fan_out), jnp.float32, -bound, bound)
        return w, b

    w_node, b_node = lin(ks[0], ks[1], in_dim, in_dim)
    w_rel, b_rel = lin(ks[2], ks[3], rel_dim, rel_dim)
    w_apply, b_apply = lin(ks[4], ks[5], in_dim + rel_dim + in_dim, out_dim)
    return dict(w_node=w_node, b_node=b_node, w_rel=w_rel, b_rel=b_rel,
                w_apply=w_apply, b_apply=b_apply)


def reference_forward(h, att, adj, rel, rel_att, params):
    """Pure-JAX reference mirroring the PyTorch/DGL forward."""
    h1 = h @ params["w_node"] + params["b_node"]
    z1 = att * h1
    msg1 = adj @ z1
    relp = rel @ params["w_rel"] + params["b_rel"]
    z2 = adj[..., None] * rel_att * relp
    msg2 = z2.sum(axis=1)
    hcat = jnp.concatenate([msg1, msg2, h1], axis=1)
    return att * jnp.maximum(hcat @ params["w_apply"] + params["b_apply"], 0.0)


if __name__ == "__main__":
    N, IN_DIM, OUT_DIM, REL_DIM = 8, 32, 32, 16

    key = jax.random.PRNGKey(0)
    k_h, k_att, k_adj, k_rel, k_ratt, k_par = jax.random.split(key, 6)

    h = jax.random.normal(k_h, (N, IN_DIM), jnp.float32)            # node feats
    att = jax.random.uniform(k_att, (N, 1), jnp.float32)            # node attention
    # dense adjacency; add self-loops so every node has in-degree >= 1.
    # TODO(synk): DGL leaves zero-in-degree nodes untouched by reduce(); the dense
    # kernel would instead give them a zero message — avoided here via self-loops.
    adj = (jax.random.uniform(k_adj, (N, N), jnp.float32) < 0.4).astype(jnp.float32)
    adj = jnp.maximum(adj, jnp.eye(N, dtype=jnp.float32))
    rel = jax.random.normal(k_rel, (N, N, REL_DIM), jnp.float32)    # edge feats
    rel_att = jax.random.uniform(k_ratt, (N, N, 1), jnp.float32)    # edge attention

    params = init_params(k_par, IN_DIM, OUT_DIM, REL_DIM)

    out = image_gcn_forward(h, att, adj, rel, rel_att, params)
    out = jax.block_until_ready(out)

    ref = reference_forward(h, att, adj, rel, rel_att, params)
    assert out.shape == (N, OUT_DIM)
    assert jnp.allclose(out, ref, atol=2e-4, rtol=2e-4)

    print("KERNEL_OK")
</pallas_src>

<mosaic_0001>
module attributes {stable_mosaic.version = 11 : i64} {
  func.func @image_gcn_kernel(%arg0: i32, %arg1: i32, %arg2: memref<8x128xf32, #tpu.memory_space<vmem>>, %arg3: memref<8x128xf32, #tpu.memory_space<vmem>>, %arg4: memref<8x1xf32, #tpu.memory_space<vmem>>, %arg5: memref<8x8xf32, #tpu.memory_space<vmem>>, %arg6: memref<8x8xf32, #tpu.memory_space<vmem>>, %arg7: memref<8x16x8xf32, #tpu.memory_space<vmem>>, %arg8: memref<128x128xf32, #tpu.memory_space<vmem>>, %arg9: memref<16x128xf32, #tpu.memory_space<vmem>>, %arg10: memref<128x128xf32, #tpu.memory_space<vmem>>, %arg11: memref<1x128xf32, #tpu.memory_space<vmem>>, %arg12: memref<1x128xf32, #tpu.memory_space<vmem>>, %arg13: memref<8x128xf32, #tpu.memory_space<vmem>>, %arg14: memref<8x128xf32, #tpu.memory_space<vmem>>, %arg15: memref<8x16xf32, #tpu.memory_space<vmem>>, %arg16: memref<8x1xf32, #tpu.memory_space<vmem>>) attributes {dimension_semantics = [#tpu.dimension_semantics<parallel>, #tpu.dimension_semantics<arbitrary>], iteration_bounds = array<i64: 1, 1>, scalar_prefetch = 0 : i64, scratch_operands = 3 : i64, tpu.core_type = #tpu.core_type<tc>, window_params = [{transform_indices = @transform_0, window_bounds = array<i64: 8, 128>}, {transform_indices = @transform_1, window_bounds = array<i64: 8, 128>}, {transform_indices = @transform_2, window_bounds = array<i64: 8, 1>}, {transform_indices = @transform_3, window_bounds = array<i64: 8, 8>}, {transform_indices = @transform_4, window_bounds = array<i64: 8, 8>}, {transform_indices = @transform_5, window_bounds = array<i64: 8, 16, 8>}, {pipeline_mode = #tpu.pipeline_mode<synchronous>, transform_indices = @transform_6, window_bounds = array<i64: 128, 128>}, {pipeline_mode = #tpu.pipeline_mode<synchronous>, transform_indices = @transform_7, window_bounds = array<i64: 16, 128>}, {pipeline_mode = #tpu.pipeline_mode<synchronous>, transform_indices = @transform_8, window_bounds = array<i64: 128, 128>}, {pipeline_mode = #tpu.pipeline_mode<synchronous>, transform_indices = @transform_9, window_bounds = array<i64: 1, 128>}, {pipeline_mode = #tpu.pipeline_mode<synchronous>, transform_indices = @transform_10, window_bounds = array<i64: 1, 128>}, {transform_indices = @transform_11, window_bounds = array<i64: 8, 128>}]} {
    %c0_i32 = arith.constant 0 : i32
    %0 = arith.cmpi eq, %arg1, %c0_i32 : i32
    %1 = arith.extui %0 : i1 to i32
    %c0_i32_0 = arith.constant 0 : i32
    %2 = arith.cmpi ne, %1, %c0_i32_0 : i32
    scf.if %2 {
      %cst_25 = arith.constant 0.000000e+00 : f32
      %26 = vector.broadcast %cst_25 : f32 to vector<8x128xf32>
      %c0_26 = arith.constant 0 : index
      %c0_27 = arith.constant 0 : index
      %27 = vector.load %arg14[%c0_26, %c0_27] : memref<8x128xf32, #tpu.memory_space<vmem>>, vector<8x128xf32>
      tpu.vector_store %arg14[%c0_26, %c0_27], %26 {strides = array<i32>} : memref<8x128xf32, #tpu.memory_space<vmem>>, vector<8x128xf32>,
      %cst_28 = arith.constant 0.000000e+00 : f32
      %28 = vector.broadcast %cst_28 : f32 to vector<8x16xf32>
      %c0_29 = arith.constant 0 : index
      %c0_30 = arith.constant 0 : index
      %29 = vector.load %arg15[%c0_29, %c0_30] : memref<8x16xf32, #tpu.memory_space<vmem>>, vector<8x16xf32>
      tpu.vector_store %arg15[%c0_29, %c0_30], %28 {strides = array<i32>} : memref<8x16xf32, #tpu.memory_space<vmem>>, vector<8x16xf32>,
      %cst_31 = arith.constant 0.000000e+00 : f32
      %30 = vector.broadcast %cst_31 : f32 to vector<8x1xf32>
      %c0_32 = arith.constant 0 : index
      %c0_33 = arith.constant 0 : index
      %31 = vector.load %arg16[%c0_32, %c0_33] : memref<8x1xf32, #tpu.memory_space<vmem>>, vector<8x1xf32>
      tpu.vector_store %arg16[%c0_32, %c0_33], %30 {strides = array<i32>} : memref<8x1xf32, #tpu.memory_space<vmem>>, vector<8x1xf32>,
    } else {
    }
    %c0 = arith.constant 0 : index
    %c0_1 = arith.constant 0 : index
    %3 = vector.load %arg14[%c0, %c0_1] : memref<8x128xf32, #tpu.memory_space<vmem>>, vector<8x128xf32>
    %c0_2 = arith.constant 0 : index
    %c0_3 = arith.constant 0 : index
    %4 = vector.load %arg5[%c0_2, %c0_3] : memref<8x8xf32, #tpu.memory_space<vmem>>, vector<8x8xf32>
    %c0_4 = arith.constant 0 : index
    %c0_5 = arith.constant 0 : index
    %5 = vector.load %arg2[%c0_4, %c0_5] : memref<8x128xf32, #tpu.memory_space<vmem>>, vector<8x128xf32>
    %cst = arith.constant dense<0.000000e+00> : vector<8x128xf32>
    %6 = tpu.matmul %4, %5, %cst {dimension_numbers = #tpu.dot_dimension_numbers<[1], [0], [0], [1], [0, 0, 1, 1], [], []>} : vector<8x8xf32>, vector<8x128xf32>, vector<8x128xf32> -> vector<8x128xf32>
    %7 = arith.addf %3, %6 : vector<8x128xf32>
    %c0_6 = arith.constant 0 : index
    %c0_7 = arith.constant 0 : index
    %8 = vector.load %arg14[%c0_6, %c0_7] : memref<8x128xf32, #tpu.memory_space<vmem>>, vector<8x128xf32>
    tpu.vector_store %arg14[%c0_6, %c0_7], %7 {strides = array<i32>} : memref<8x128xf32, #tpu.memory_space<vmem>>, vector<8x128xf32>,
    %c0_8 = arith.constant 0 : index
    %c0_9 = arith.constant 0 : index
    %9 = vector.load %arg6[%c0_8, %c0_9] : memref<8x8xf32, #tpu.memory_space<vmem>>, vector<8x8xf32>
    %c0_10 = arith.constant 0 : index
    %c0_11 = arith.constant 0 : index
    %10 = vector.load %arg15[%c0_10, %c0_11] : memref<8x16xf32, #tpu.memory_space<vmem>>, vector<8x16xf32>
    %11 = vector.shape_cast %9 : vector<8x8xf32> to vector<8x1x8xf32>
    %c0_12 = arith.constant 0 : index
    %c0_13 = arith.constant 0 : index
    %c0_14 = arith.constant 0 : index
    %12 = vector.load %arg7[%c0_12, %c0_13, %c0_14] : memref<8x16x8xf32, #tpu.memory_space<vmem>>, vector<8x16x8xf32>
    %13 = vector.broadcast %11 : vector<8x1x8xf32> to vector<8x16x8xf32>
    %14 = arith.mulf %13, %12 : vector<8x16x8xf32>
    %cst_15 = arith.constant dense<0.000000e+00> : vector<8x16xf32>
    %15 = vector.multi_reduction <add>, %14, %cst_15 [2] : vector<8x16x8xf32> to vector<8x16xf32>
    %16 = arith.addf %10, %15 : vector<8x16xf32>
    %c0_16 = arith.constant 0 : index
    %c0_17 = arith.constant 0 : index
    %17 = vector.load %arg15[%c0_16, %c0_17] : memref<8x16xf32, #tpu.memory_space<vmem>>, vector<8x16xf32>
    tpu.vector_store %arg15[%c0_16, %c0_17], %16 {strides = array<i32>} : memref<8x16xf32, #tpu.memory_space<vmem>>, vector<8x16xf32>,
    %c0_18 = arith.constant 0 : index
    %c0_19 = arith.constant 0 : index
    %18 = vector.load %arg16[%c0_18, %c0_19] : memref<8x1xf32, #tpu.memory_space<vmem>>, vector<8x1xf32>
    %cst_20 = arith.constant dense<0.000000e+00> : vector<8xf32>
    %19 = vector.multi_reduction <add>, %9, %cst_20 [1] : vector<8x8xf32> to vector<8xf32>
    %20 = vector.shape_cast %19 : vector<8xf32> to vector<8x1xf32>
    %21 = arith.addf %18, %20 : vector<8x1xf32>
    %c0_21 = arith.constant 0 : index
    %c0_22 = arith.constant 0 : index
    %22 = vector.load %arg16[%c0_21, %c0_22] : memref<8x1xf32, #tpu.memory_space<vmem>>, vector<8x1xf32>
    tpu.vector_store %arg16[%c0_21, %c0_22], %21 {strides = array<i32>} : memref<8x1xf32, #tpu.memory_space<vmem>>, vector<8x1xf32>,
    %c0_i32_23 = arith.constant 0 : i32
    %23 = arith.cmpi eq, %arg1, %c0_i32_23 : i32
    %24 = arith.extui %23 : i1 to i32
    %c0_i32_24 = arith.constant 0 : i32
    %25 = arith.cmpi ne, %24, %c0_i32_24 : i32
    scf.if %25 {
      %c0_25 = arith.constant 0 : index
      %c0_26 = arith.constant 0 : index
      %26 = vector.load %arg14[%c0_25, %c0_26] : memref<8x128xf32, #tpu.memory_space<vmem>>, vector<8x128xf32>
      %c0_27 = arith.constant 0 : index
      %c0_28 = arith.constant 0 : index
      %27 = vector.load %arg8[%c0_27, %c0_28] : memref<128x128xf32, #tpu.memory_space<vmem>>, vector<128x128xf32>
      %cst_29 = arith.constant dense<0.000000e+00> : vector<8x128xf32>
      %28 = tpu.matmul %26, %27, %cst_29 {dimension_numbers = #tpu.dot_dimension_numbers<[1], [0], [0], [1], [0, 0, 1, 1], [], []>} : vector<8x128xf32>, vector<128x128xf32>, vector<8x128xf32> -> vector<8x128xf32>
      %c0_30 = arith.constant 0 : index
      %c0_31 = arith.constant 0 : index
      %29 = vector.load %arg15[%c0_30, %c0_31] : memref<8x16xf32, #tpu.memory_space<vmem>>, vector<8x16xf32>
      %c0_32 = arith.constant 0 : index
      %c0_33 = arith.constant 0 : index
      %30 = vector.load %arg9[%c0_32, %c0_33] : memref<16x128xf32, #tpu.memory_space<vmem>>, vector<16x128xf32>
      %cst_34 = arith.constant dense<0.000000e+00> : vector<8x128xf32>
      %31 = tpu.matmul %29, %30, %cst_34 {dimension_numbers = #tpu.dot_dimension_numbers<[1], [0], [0], [1], [0, 0, 1, 1], [], []>} : vector<8x16xf32>, vector<16x128xf32>, vector<8x128xf32> -> vector<8x128xf32>
      %32 = arith.addf %28, %31 : vector<8x128xf32>
      %c0_35 = arith.constant 0 : index
      %c0_36 = arith.constant 0 : index
      %33 = vector.load %arg3[%c0_35, %c0_36] : memref<8x128xf32, #tpu.memory_space<vmem>>, vector<8x128xf32>
      %c0_37 = arith.constant 0 : index
      %c0_38 = arith.constant 0 : index
      %34 = vector.load %arg10[%c0_37, %c0_38] : memref<128x128xf32, #tpu.memory_space<vmem>>, vector<128x128xf32>
      %cst_39 = arith.constant dense<0.000000e+00> : vector<8x128xf32>
      %35 = tpu.matmul %33, %34, %cst_39 {dimension_numbers = #tpu.dot_dimension_numbers<[1], [0], [0], [1], [0, 0, 1, 1], [], []>} : vector<8x128xf32>, vector<128x128xf32>, vector<8x128xf32> -> vector<8x128xf32>
      %36 = arith.addf %32, %35 : vector<8x128xf32>
      %c0_40 = arith.constant 0 : index
      %c0_41 = arith.constant 0 : index
      %37 = vector.load %arg16[%c0_40, %c0_41] : memref<8x1xf32, #tpu.memory_space<vmem>>, vector<8x1xf32>
      %c0_42 = arith.constant 0 : index
      %c0_43 = arith.constant 0 : index
      %38 = vector.load %arg11[%c0_42, %c0_43] : memref<1x128xf32, #tpu.memory_space<vmem>>, vector<1x128xf32>
      %39 = vector.broadcast %37 : vector<8x1xf32> to vector<8x128xf32>
      %40 = vector.broadcast %38 : vector<1x128xf32> to vector<8x128xf32>
      %41 = arith.mulf %39, %40 : vector<8x128xf32>
      %42 = arith.addf %36, %41 : vector<8x128xf32>
      %c0_44 = arith.constant 0 : index
      %c0_45 = arith.constant 0 : index
      %43 = vector.load %arg12[%c0_44, %c0_45] : memref<1x128xf32, #tpu.memory_space<vmem>>, vector<1x128xf32>
      %44 = vector.broadcast %43 : vector<1x128xf32> to vector<8x128xf32>
      %45 = arith.addf %42, %44 : vector<8x128xf32>
      %c0_46 = arith.constant 0 : index
      %c0_47 = arith.constant 0 : index
      %46 = vector.load %arg4[%c0_46, %c0_47] : memref<8x1xf32, #tpu.memory_space<vmem>>, vector<8x1xf32>
      %cst_48 = arith.constant 0.000000e+00 : f32
      %47 = vector.broadcast %cst_48 : f32 to vector<8x128xf32>
      %48 = arith.maximumf %45, %47 : vector<8x128xf32>
      %49 = vector.broadcast %46 : vector<8x1xf32> to vector<8x128xf32>
      %50 = arith.mulf %49, %48 : vector<8x128xf32>
      %c0_49 = arith.constant 0 : index
      %c0_50 = arith.constant 0 : index
      %51 = vector.load %arg13[%c0_49, %c0_50] : memref<8x128xf32, #tpu.memory_space<vmem>>, vector<8x128xf32>
      tpu.vector_store %arg13[%c0_49, %c0_50], %50 {strides = array<i32>} : memref<8x128xf32, #tpu.memory_space<vmem>>, vector<8x128xf32>,
    } else {
    }
    return
  }
  func.func @transform_0(%arg0: i32, %arg1: i32) -> (i32, i32) {
    %c0_i32 = arith.constant 0 : i32
    %c0_i32_0 = arith.constant 0 : i32
    return %arg1, %c0_i32 : i32, i32
  }
  func.func @transform_1(%arg0: i32, %arg1: i32) -> (i32, i32) {
    %c0_i32 = arith.constant 0 : i32
    %c0_i32_0 = arith.constant 0 : i32
    return %arg0, %c0_i32 : i32, i32
  }
  func.func @transform_2(%arg0: i32, %arg1: i32) -> (i32, i32) {
    %c0_i32 = arith.constant 0 : i32
    %c0_i32_0 = arith.constant 0 : i32
    return %arg0, %c0_i32 : i32, i32
  }
  func.func @transform_3(%arg0: i32, %arg1: i32) -> (i32, i32) {
    %c0_i32 = arith.constant 0 : i32
    return %arg0, %arg1 : i32, i32
  }
  func.func @transform_4(%arg0: i32, %arg1: i32) -> (i32, i32) {
    %c0_i32 = arith.constant 0 : i32
    return %arg0, %arg1 : i32, i32
  }
  func.func @transform_5(%arg0: i32, %arg1: i32) -> (i32, i32, i32) {
    %c0_i32 = arith.constant 0 : i32
    %c0_i32_0 = arith.constant 0 : i32
    return %arg0, %c0_i32, %arg1 : i32, i32, i32
  }
  func.func @transform_6(%arg0: i32, %arg1: i32) -> (i32, i32) {
    %c0_i32 = arith.constant 0 : i32
    %c0_i32_0 = arith.constant 0 : i32
    %c0_i32_1 = arith.constant 0 : i32
    return %c0_i32, %c0_i32_0 : i32, i32
  }
  func.func @transform_7(%arg0: i32, %arg1: i32) -> (i32, i32) {
    %c0_i32 = arith.constant 0 : i32
    %c0_i32_0 = arith.constant 0 : i32
    %c0_i32_1 = arith.constant 0 : i32
    return %c0_i32, %c0_i32_0 : i32, i32
  }
  func.func @transform_8(%arg0: i32, %arg1: i32) -> (i32, i32) {
    %c0_i32 = arith.constant 0 : i32
    %c0_i32_0 = arith.constant 0 : i32
    %c0_i32_1 = arith.constant 0 : i32
    return %c0_i32, %c0_i32_0 : i32, i32
  }
  func.func @transform_9(%arg0: i32, %arg1: i32) -> (i32, i32) {
    %c0_i32 = arith.constant 0 : i32
    %c0_i32_0 = arith.constant 0 : i32
    %c0_i32_1 = arith.constant 0 : i32
    return %c0_i32, %c0_i32_0 : i32, i32
  }
  func.func @transform_10(%arg0: i32, %arg1: i32) -> (i32, i32) {
    %c0_i32 = arith.constant 0 : i32
    %c0_i32_0 = arith.constant 0 : i32
    %c0_i32_1 = arith.constant 0 : i32
    return %c0_i32, %c0_i32_0 : i32, i32
  }
  func.func @transform_11(%arg0: i32, %arg1: i32) -> (i32, i32) {
    %c0_i32 = arith.constant 0 : i32
    %c0_i32_0 = arith.constant 0 : i32
    return %arg0, %c0_i32 : i32, i32
  }
}

</mosaic_0001>

<bundles_post_ra>
// kernel: tpu_custom_call.1
= control target key start
LH: loop header
LB: loop body
LE: loop exit
PB: predicated region body
PF: predicated region fallthrough
CT: control target
= control target key end

     0   :  { %16 = vsyncpa [#allocation6], 0  ;;  %s725_s0 = inlined_call_operand.vmem [shape: f32[8,128], index: 0, kind: input, shape index: {}]   ;;  %s726_s1 = inlined_call_operand.vmem [shape: f32[8,128], index: 1, kind: input, shape index: {}]   ;;  %s727_s2 = inlined_call_operand.vmem [shape: f32[8,1], index: 2, kind: input, shape index: {}]   ;;  %s728_s3 = inlined_call_operand.vmem [shape: f32[8,8], index: 3, kind: input, shape index: {}]   ;;  %s729_s4 = inlined_call_operand.vmem [shape: f32[8,8], index: 4, kind: input, shape index: {}]   ;;  %s730_s5 = inlined_call_operand.vmem [shape: f32[8,16,8], index: 5, kind: input, shape index: {}]   ;;  %s731_s6 = inlined_call_operand.vmem [shape: f32[128,128], index: 6, kind: input, shape index: {}]   ;;  %s732_s7 = inlined_call_operand.vmem [shape: f32[16,128], index: 7, kind: input, shape index: {}]   ;;  %s733_s8 = inlined_call_operand.hbm [shape: f32[128,128], index: 8, kind: input, shape index: {}]   ;;  %s734_s9 = inlined_call_operand.vmem [shape: f32[1,128], index: 9, kind: input, shape index: {}]   ;;  %s735_s10 = inlined_call_operand.vmem [shape: f32[1,128], index: 10, kind: input, shape index: {}]   ;;  %s736_s11 = inlined_call_operand.hbm [shape: f32[8,128], index: 11, kind: output, shape index: {}]  }
   0x1   :  { %17 = vsyncpa [#allocation7], 0  ;;  %s38_s19 = sshll.u32 %s733_s8, 4  ;;  %s479_s20 = smov [#allocation5]   ;;  %s39_s19 = int_to_ptr.hbm [resolvable:$true] %s38_s19 }
   0x2   :  { %s40_s21 = sshll.u32 %s479_s20, 4  ;;  %s480_s22 = smov 128   ;;  %s41_s21 = int_to_ptr.vmem [resolvable:$true] %s40_s21 }
   0x3   :  { %s481_s23 = smov 8  }
   0x4   :  { %46 = dma.hbm_to_vmem [thread:$0]  %s39_s19, 2048, %s41_s21, [#allocation6], %s480_s22, %s480_s22, %s481_s23  }
   0x5   :  { %475 = dma.done.wait [#allocation6], 2048  }
   0x6   :  { %476 = vsyncadd [#allocation6], 4294965248  ;;  %v551_v0 = vld [vmem:[%s729_s4] sm:$0xff]  ;;  %vm67_vm0 = vcmask 64512   ;;  %v105_v6 = vld [vmem:[%s730_s5 + $0x10] sm:$0xff]  ;;  %vm60_vm1 = vcmask 130048  }
   0x7   :  { %v103_v1 = vld [vmem:[%s730_s5] sm:$0xff]  ;;  %v119_v2 = vperm.slane %v551_v0, 0  ;;  %v97_v3 = vrot.slane %v551_v0, 2  ;;  %v96_v4 = vrot.slane %v551_v0, 1  ;;  %v104_v10 = vld [vmem:[%s730_s5 + $0x8] sm:$0xff]  ;;  %v106_v15 = vld [vmem:[%s730_s5 + $0x18] sm:$0xff] }
   0x8   :  { %v107_v5 = vld [vmem:[%s730_s5 + $0x20] sm:$0xff]  ;;  %v108_v14 = vld [vmem:[%s730_s5 + $0x28] sm:$0xff]  ;;  %v98_v19 = vrot.slane %v551_v0, 3  ;;  %v99_v24 = vrot.slane %v551_v0, 4  ;;  %v109_v27 = vld [vmem:[%s730_s5 + $0x30] sm:$0xff]  ;;  %v100_v36 = vrot.slane %v551_v0, 5 }
   0x9   :  { %v135_v7 = vmul.f32 %v119_v2, %v103_v1  ;;  %v121_v8 = vperm.slane %v97_v3, 0  ;;  %v120_v9 = vperm.slane %v96_v4, 0  ;;  %v136_v18 = vmul.f32 %v119_v2, %v104_v10  ;;  %v66_v20 = vld [vmem:[%s725_s0] sm:$0xff]  ;;  %v110_v32 = vld [vmem:[%s730_s5 + $0x38] sm:$0xff]  ;;  %v112_v38 = vld [vmem:[%s730_s5 + $0x48] sm:$0xff]  ;;  %s484_s30 = smov [#allocation8]  }
   0xa   :  { %v65_v21 = vld [vmem:[%s728_s3] sm:$0xff]  ;;  %86 = vmatpush.msra.mxu0 %v66_v20  ;;  %v122_v26 = vperm.slane %v98_v19, 0  ;;  %v123_v30 = vperm.slane %v99_v24, 0  ;;  %v124_v41 = vperm.slane %v100_v36, 0  ;;  %v114_v42 = vld [vmem:[%s730_s5 + $0x58] sm:$0xff]  ;;  %v113_v43 = vld [vmem:[%s730_s5 + $0x50] sm:$0xff] }
   0xb   :  { %v151_v11 = vsel %vm67_vm0, %v135_v7, 0.0  ;;  %v139_v12 = vmul.f32 %v121_v8, %v107_v5  ;;  %v137_v13 = vmul.f32 %v120_v9, %v105_v6  ;;  %v140_v22 = vmul.f32 %v121_v8, %v108_v14  ;;  %415 = vmatmul.msk.f32.vlgmr.msra.gmra.mxu0 %vm67_vm0, %v65_v21  ;;  %v111_v31 = vld [vmem:[%s730_s5 + $0x40] sm:$0xff]  ;;  %v116_v55 = vld [vmem:[%s730_s5 + $0x68] sm:$0xff]  ;;  %v117_v56 = vld [vmem:[%s730_s5 + $0x70] sm:$0xff]  ;;  %s403_s4 = sshll.u32 %s484_s30, 4  ;;  %s404_s4 = int_to_ptr.vmem [resolvable:$true] %s403_s4 }
   0xc   :  { %152 = vadd.xlane.f32.xlu0 %v151_v11  ;;  %v138_v23 = vmul.f32 %v120_v9, %v106_v15  ;;  %v154_v25 = vsel %vm67_vm0, %v136_v18, 0.0  ;;  %v141_v33 = vmul.f32 %v122_v26, %v109_v27  ;;  %v143_v34 = vmul.f32 %v123_v30, %v111_v31  ;;  %v115_v51 = vld [vmem:[%s730_s5 + $0x60] sm:$0xff]  ;;  %v118_v61 = vld [vmem:[%s730_s5 + $0x78] sm:$0xff]  ;;  %v286_v5 = vld [vmem:[%s731_s6 + $0x70] sm:$0xff] }
   0xd   :  { %v163_v16 = vsel %vm67_vm0, %v139_v12, 0.0  ;;  %v157_v17 = vsel %vm67_vm0, %v137_v13, 0.0  ;;  %v166_v28 = vsel %vm67_vm0, %v140_v22, 0.0  ;;  %v142_v35 = vmul.f32 %v122_v26, %v110_v32  ;;  %v287_v4 = vld [vmem:[%s731_s6 + $0x78] sm:$0xff]  ;;  %v350_v6 = vld [vmem:[#allocation5 + $0x78] sm:$0xff]  ;;  %v349_v8 = vld [vmem:[#allocation5 + $0x70] sm:$0xff] }
   0xe   :  { %164 = vadd.xlane.f32.xlu2 %v163_v16  ;;  %158 = vadd.xlane.f32.xlu1 %v157_v17  ;;  %v160_v29 = vsel %vm67_vm0, %v138_v23, 0.0  ;;  %v169_v37 = vsel %vm67_vm0, %v141_v33, 0.0  ;;  %v175_v39 = vsel %vm67_vm0, %v143_v34, 0.0  ;;  %v144_v44 = vmul.f32 %v123_v30, %v112_v38  ;;  %v285_v7 = vld [vmem:[%s731_s6 + $0x68] sm:$0xff]  ;;  %v348_v9 = vld [vmem:[#allocation5 + $0x68] sm:$0xff]  ;;  %v347_v11 = vld [vmem:[#allocation5 + $0x60] sm:$0xff] }
   0xf   :  { %v172_v40 = vsel %vm67_vm0, %v142_v35, 0.0  ;;  %v101_v45 = vrot.slane %v551_v0, 6  ;;  %v146_v46 = vmul.f32 %v124_v41, %v114_v42  ;;  %v145_v47 = vmul.f32 %v124_v41, %v113_v43  ;;  %314 = vmatpush.msra.mxu2 %v287_v4  ;;  %351 = vmatpush.msra.mxu3 %v350_v6  ;;  %v283_v10 = vld [vmem:[%s731_s6 + $0x58] sm:$0xff]  ;;  %v282_v12 = vld [vmem:[%s731_s6 + $0x50] sm:$0xff]  ;;  %v346_v13 = vld [vmem:[#allocation5 + $0x58] sm:$0xff] }
  0x10   :  { %v102_v48 = vrot.slane %v551_v0, 7  ;;  %v178_v49 = vsel %vm67_vm0, %v144_v44, 0.0  ;;  %v262_v3 = vsel %vm67_vm0, %v551_v0, 0.0  ;;  %v284_v0 = vld [vmem:[%s731_s6 + $0x60] sm:$0xff]  ;;  %v281_v14 = vld [vmem:[%s731_s6 + $0x48] sm:$0xff]  ;;  %v344_v17 = vld [vmem:[#allocation5 + $0x48] sm:$0xff] }
  0x11   :  { %v125_v50 = vperm.slane %v101_v45, 0  ;;  %v184_v52 = vsel %vm67_vm0, %v146_v46, 0.0  ;;  %v181_v53 = vsel %vm67_vm0, %v145_v47, 0.0  ;;  %315 = vmatpush.msra.mxu2 %v286_v5  ;;  %352 = vmatpush.msra.mxu3 %v349_v8  ;;  %v345_v15 = vld [vmem:[#allocation5 + $0x50] sm:$0xff]  ;;  %v279_v19 = vld [vmem:[%s731_s6 + $0x38] sm:$0xff]  ;;  %v343_v20 = vld [vmem:[#allocation5 + $0x40] sm:$0xff] }
  0x12   :  { %v126_v54 = vperm.slane %v102_v48, 0  ;;  %v280_v16 = vld [vmem:[%s731_s6 + $0x40] sm:$0xff]  ;;  %v278_v23 = vld [vmem:[%s731_s6 + $0x30] sm:$0xff]  ;;  %v342_v24 = vld [vmem:[#allocation5 + $0x38] sm:$0xff]  ;;  %v482_v27 = vmov 0.0   ;;  %vm62_vm2 = vcmask 7168  }
  0x13   :  { %v147_v57 = vmul.f32 %v125_v50, %v115_v51  ;;  %v148_v58 = vmul.f32 %v125_v50, %v116_v55  ;;  %316 = vmatpush.msra.mxu2 %v285_v7  ;;  %353 = vmatpush.msra.mxu3 %v348_v9  ;;  %v341_v26 = vld [vmem:[#allocation5 + $0x30] sm:$0xff]  ;;  %61 = vst.msk [vmem:[#allocation3] sm:$0xff] %vm60_vm1, %v482_v27  ;;  %v275_v31 = vld [vmem:[%s731_s6 + $0x18] sm:$0xff]  ;;  %v339_v32 = vld [vmem:[#allocation5 + $0x20] sm:$0xff]  ;;  %vm220_vm3 = vcmask 130112   ;;  %vm243_vm4 = vcmask 1041409  }
  0x14   :  { %155 = vadd.xlane.f32.xlu0 %v154_v25  ;;  %v149_v59 = vmul.f32 %v126_v54, %v117_v56  ;;  %v150_v1 = vmul.f32 %v126_v54, %v118_v61  ;;  %v277_v25 = vld [vmem:[%s731_s6 + $0x28] sm:$0xff]  ;;  %v274_v35 = vld [vmem:[%s731_s6 + $0x10] sm:$0xff]  ;;  %v337_v38 = vld [vmem:[#allocation5 + $0x10] sm:$0xff]  ;;  %63 = vst.msk [vmem:[#allocation4] sm:$0xff] %vm62_vm2, %v482_v27  ;;  %vm245_vm5 = vcmask 1042434   ;;  %vm247_vm6 = vcmask 1043459  }
  0x15   :  { %v187_v60 = vsel %vm67_vm0, %v147_v57, 0.0  ;;  %v190_v62 = vsel %vm67_vm0, %v148_v58, 0.0  ;;  %317 = vmatpush.msra.mxu2 %v284_v0  ;;  %354 = vmatpush.msra.mxu3 %v347_v11  ;;  %v338_v36 = vld [vmem:[#allocation5 + $0x18] sm:$0xff]  ;;  %v289_v43 = vld [vmem:[%s732_s7] sm:$0xff]  ;;  %v335_v44 = vld [vmem:[#allocation5] sm:$0xff]  ;;  %vm249_vm7 = vcmask 1044484  }
  0x16   :  { %167 = vadd.xlane.f32.xlu2 %v166_v28  ;;  %161 = vadd.xlane.f32.xlu1 %v160_v29  ;;  %v193_v63 = vsel %vm67_vm0, %v149_v59, 0.0  ;;  %v196_v2 = vsel %vm67_vm0, %v150_v1, 0.0  ;;  %v276_v28 = vld [vmem:[%s731_s6 + $0x20] sm:$0xff]  ;;  %v340_v29 = vld [vmem:[#allocation5 + $0x28] sm:$0xff]  ;;  %v290_v42 = vld [vmem:[%s732_s7 + $0x8] sm:$0xff]  ;;  %vm251_vm8 = vcmask 1045509  }
  0x17   :  { %318 = vmatpush.msra.mxu2 %v283_v10  ;;  %355 = vmatpush.msra.mxu3 %v346_v13  ;;  %v334_v46 = vld [vmem:[%s726_s1] sm:$0xff]  ;;  %vm253_vm9 = vcmask 1046534   ;;  %vm255_vm10 = vcmask 1047559  }
  0x18   :  { %308 = vmatpush.msra.mxu1 %v290_v42  ;;  %v389_v51 = vld [vmem:[%s727_s2] sm:$0xff] }
  0x19   :  { %319 = vmatpush.msra.mxu2 %v282_v12  ;;  %356 = vmatpush.msra.mxu3 %v345_v15 }
  0x1a   :  { %309 = vmatpush.msra.mxu1 %v289_v43  ;;  %v426_v43 = vld [vmem:[%s735_s10] ss:$0 sm:$0xff] }
  0x1b   :  { %320 = vmatpush.msra.mxu2 %v281_v14  ;;  %357 = vmatpush.msra.mxu3 %v344_v17 }
  0x1c   :  { %170 = vadd.xlane.f32.xlu0 %v169_v37  ;;  %v273_v37 = vld [vmem:[%s731_s6 + $0x8] sm:$0xff] }
  0x1d   :  { %321 = vmatpush.msra.mxu2 %v280_v16  ;;  %358 = vmatpush.msra.mxu3 %v343_v20 }
  0x1e   :  { %176 = vadd.xlane.f32.xlu2 %v175_v39  ;;  %173 = vadd.xlane.f32.xlu1 %v172_v40  ;;  %v272_v39 = vld [vmem:[%s731_s6] sm:$0xff]  ;;  %v336_v40 = vld [vmem:[#allocation5 + $0x8] sm:$0xff] }
  0x1f   :  { %322 = vmatpush.msra.mxu2 %v279_v19  ;;  %359 = vmatpush.msra.mxu3 %v342_v24 }
  0x21   :  { %323 = vmatpush.msra.mxu2 %v278_v23  ;;  %360 = vmatpush.msra.mxu3 %v341_v26  ;;  %v261_v23 = vld [vmem:[#allocation4] sm:$0xff]  ;;  %v94_v26 = vld [vmem:[#allocation3] sm:$0xff] }
  0x23   :  { %324 = vmatpush.msra.mxu2 %v277_v25  ;;  %361 = vmatpush.msra.mxu3 %v340_v29 }
  0x24   :  { %179 = vadd.xlane.f32.xlu0 %v178_v49  ;;  %v215_v49 = vlaneseq }
  0x25   :  { %325 = vmatpush.msra.mxu2 %v276_v28  ;;  %362 = vmatpush.msra.mxu3 %v339_v32 }
  0x26   :  { %185 = vadd.xlane.f32.xlu2 %v184_v52  ;;  %182 = vadd.xlane.f32.xlu1 %v181_v53  ;;  %v216_v50 = vand.u32 127, %v215_v49  ;;  %v483_v53 = vmov 0  }
  0x27   :  { %326 = vmatpush.msra.mxu2 %v275_v31  ;;  %363 = vmatpush.msra.mxu3 %v338_v36 }
  0x28   :  { %424 = vset.pattern.permute.xlu0 %v483_v53  ;;  %423 = vset.pattern.permute.xlu2 %v483_v53  ;;  %v218_v54 = vadd.s32 4294967288, %v216_v50 }
  0x29   :  { %327 = vmatpush.msra.mxu2 %v274_v35  ;;  %364 = vmatpush.msra.mxu3 %v337_v38  ;;  %v425_v35 = vld [vmem:[%s734_s9] ss:$0 sm:$0xff]  ;;  %s405_s9 = sshll.u32 %s736_s11, 4  ;;  %s406_s9 = int_to_ptr.hbm [resolvable:$true] %s405_s9 }
  0x2b   :  { %328 = vmatpush.msra.mxu2 %v273_v37  ;;  %365 = vmatpush.msra.mxu3 %v336_v40 }
  0x2c   :  { %188 = vadd.xlane.f32.xlu0 %v187_v60 }
  0x2d   :  { %329 = vmatpush.msra.mxu2 %v272_v39  ;;  %366 = vmatpush.msra.mxu3 %v335_v44 }
  0x2e   :  { %191 = vadd.xlane.f32.xlu1 %v190_v62  ;;  %194 = vadd.xlane.f32.xlu2 %v193_v63 }
  0x2f   :  { %367 = vmatmul.f32.vlgmr.msra.gmra.mxu3 %v334_v46 }
  0x34   :  { %197 = vadd.xlane.f32.xlu0 %v196_v2 }
  0x36   :  { %263 = vadd.xlane.f32.xlu1 %v262_v3 }
  0x48   :  { %393 = vperm.xlu0 %424, %v389_v51  }
  0x7f   :  { %v658_v18 = vpop.xlane.xlu0 %152 }
  0x80   :  { %v217_v61 = vperm.slane %v658_v18, %v216_v50 }
  0x81   :  { %v663_v21 = vpop.xlane.xlu2 %164  ;;  %v665_v22 = vpop.xlane.xlu1 %158 }
  0x82   :  { %v222_v58 = vperm.slane %v665_v22, %v216_v50  ;;  %v225_v1 = vperm.slane %v663_v21, %v216_v50 }
  0x87   :  { %v156_v30 = vpop.xlane.xlu0 %155 }
  0x88   :  { %v88_v41 = vpop.f32.mrf.mxu0  ;;  %v219_v59 = vperm.slane %v156_v30, %v218_v54 }
  0x89   :  { %v168_v33 = vpop.xlane.xlu2 %167  ;;  %v162_v34 = vpop.xlane.xlu1 %161  ;;  %330 = vmatmul.f32.vlgmr.msra.gmra.mxu2 %v88_v41 }
  0x8a   :  { %v223_v56 = vperm.slane %v162_v34, %v218_v54  ;;  %v226_v60 = vperm.slane %v168_v33, %v218_v54  ;;  %v221_v5 = vsel %vm220_vm3, %v219_v59, %v217_v61 }
  0x8c   :  { %v224_v62 = vsel %vm220_vm3, %v223_v56, %v222_v58  ;;  %v227_v7 = vsel %vm220_vm3, %v226_v60, %v225_v1 }
  0x8d   :  { %v244_v8 = vsel %vm243_vm4, %v224_v62, %v221_v5 }
  0x8e   :  { %v246_v15 = vsel %vm245_vm5, %v227_v7, %v244_v8 }
  0x8f   :  { %v171_v45 = vpop.xlane.xlu0 %170 }
  0x90   :  { %v228_v6 = vperm.slane %v171_v45, %v216_v50 }
  0x91   :  { %v177_v47 = vpop.xlane.xlu2 %176  ;;  %v174_v48 = vpop.xlane.xlu1 %173 }
  0x92   :  { %v229_v63 = vperm.slane %v174_v48, %v218_v54  ;;  %v231_v2 = vperm.slane %v177_v47, %v216_v50 }
  0x94   :  { %v230_v9 = vsel %vm220_vm3, %v229_v63, %v228_v6 }
  0x95   :  { %v248_v16 = vsel %vm247_vm6, %v230_v9, %v246_v15 }
  0x97   :  { %v180_v52 = vpop.xlane.xlu0 %179 }
  0x98   :  { %v232_v3 = vperm.slane %v180_v52, %v218_v54 }
  0x99   :  { %v183_v55 = vpop.xlane.xlu1 %182  ;;  %v186_v57 = vpop.xlane.xlu2 %185 }
  0x9a   :  { %v235_v10 = vperm.slane %v186_v57, %v218_v54  ;;  %v234_v11 = vperm.slane %v183_v55, %v216_v50  ;;  %v233_v12 = vsel %vm220_vm3, %v232_v3, %v231_v2 }
  0x9b   :  { %v250_v18 = vsel %vm249_vm7, %v233_v12, %v248_v16 }
  0x9c   :  { %v236_v19 = vsel %vm220_vm3, %v235_v10, %v234_v11 }
  0x9d   :  { %v252_v25 = vsel %vm251_vm8, %v236_v19, %v250_v18 }
  0x9f   :  { %v189_v4 = vpop.xlane.xlu0 %188 }
  0xa0   :  { %v237_v17 = vperm.slane %v189_v4, %v216_v50 }
  0xa1   :  { %v192_v0 = vpop.xlane.xlu1 %191  ;;  %v195_v14 = vpop.xlane.xlu2 %194 }
  0xa2   :  { %v238_v13 = vperm.slane %v192_v0, %v218_v54  ;;  %v240_v20 = vperm.slane %v195_v14, %v216_v50 }
  0xa4   :  { %v239_v21 = vsel %vm220_vm3, %v238_v13, %v237_v17 }
  0xa5   :  { %v254_v28 = vsel %vm253_vm9, %v239_v21, %v252_v25 }
  0xa7   :  { %v198_v22 = vpop.xlane.xlu0 %197 }
  0xa8   :  { %v241_v24 = vperm.slane %v198_v22, %v218_v54 }
  0xa9   :  { %v264_v27 = vpop.xlane.xlu1 %263 }
  0xaa   :  { %v242_v29 = vsel %vm220_vm3, %v241_v24, %v240_v20  ;;  %v265_v30 = vadd.f32 %v264_v27, %v261_v23 }
  0xab   :  { %v256_v31 = vsel %vm255_vm10, %v242_v29, %v254_v28 }
  0xac   :  { %v258_v32 = vadd.f32 %v256_v31, %v94_v26  ;;  %267 = vst.msk [vmem:[#allocation4] sm:$0xff] %vm62_vm2, %v265_v30 }
  0xae   :  { %260 = vst.msk [vmem:[#allocation3] sm:$0xff] %vm60_vm1, %v258_v32 }
  0xb2   :  { %v368_v39 = vpop.f32.mrf.mxu3 }
  0xb3   :  { %v372_v33 = vld [vmem:[#allocation4] sm:$0xff] }
  0xb4   :  { %376 = vperm.xlu2 %423, %v372_v33  }
  0xb5   :  { %v288_v34 = vld [vmem:[#allocation3] sm:$0xff] }
  0xb6   :  { %416 = vmatmul.msk.f32.vlgmr.msra.gmra.mxu1 %vm60_vm1, %v288_v34 }
  0xba   :  { %v394_v46 = vpop.permute.xlu0 %393 }
 0x10c   :  { %v331_v36 = vpop.f32.mrf.mxu2 }
 0x10e   :  { %v377_v37 = vpop.permute.xlu2 %376 }
 0x10f   :  { %v382_v41 = vmul.f32 %v425_v35, %v377_v37 }
 0x133   :  { %v311_v38 = vpop.f32.mrf.mxu1 }
 0x134   :  { %v332_v40 = vadd.f32 %v331_v36, %v311_v38 }
 0x136   :  { %v371_v42 = vadd.f32 %v368_v39, %v332_v40 }
 0x138   :  { %v383_v44 = vadd.f32 %v382_v41, %v371_v42 }
 0x13a   :  { %v388_v45 = vadd.f32 %v426_v43, %v383_v44 }
 0x13c   :  { %v390_v47 = vmax.f32 %v388_v45, 0.0 }
 0x13e   :  { %v396_v48 = vmul.f32 %v394_v46, %v390_v47 }
 0x140   :  { %397 = vst [vmem:[#allocation8] sm:$0xff] %v396_v48 }
 0x141   :  { %408 = dma.vmem_to_hbm [thread:$0]  %s404_s4, 128, %s406_s9, [#allocation7]  }
 0x142   :  { %477 = dma.done.wait [#allocation7], 128  }
 0x143   :  { %478 = vsyncadd [#allocation7], 4294967168 }
 0x144   :  { %413 = vsyncpa [#allocation6], 1 }
 0x145   :  { %414 = vsyncpa [#allocation7], 1 }

</bundles_post_ra>
